<compile_context>
chip_gen: v6e
topology: v6e:2x2x1
jax: 0.10.0
libtpu: 0.0.40
codegen_flags: <defaults>
</compile_context>

<pallas_src>
import functools

import jax
import jax.numpy as jnp
from jax.experimental import pallas as pl
from jax.experimental.pallas import tpu as pltpu


_NEG_PAD = -1.0e9   # column padding for logits: exp -> 0 after temperature scaling


def _dino_loss_kernel(s_ref, t_ref, c_ref, sr_ref, tr_ref,          # inputs
                      ce_ref, mse_ref,                               # outputs
                      m_s, l_s, m_t, l_t, w_acc, mse_acc,            # VMEM scratch
                      *, inv_student_temp, inv_teacher_temp):
    d = pl.program_id(1)
    nd = pl.num_programs(1)

    @pl.when(d == 0)
    def _init():
        neg_inf = jnp.full(m_s.shape, -jnp.inf, dtype=jnp.float32)
        m_s[...] = neg_inf
        m_t[...] = neg_inf
        l_s[...] = jnp.zeros(l_s.shape, jnp.float32)
        l_t[...] = jnp.zeros(l_t.shape, jnp.float32)
        w_acc[...] = jnp.zeros(w_acc.shape, jnp.float32)
        mse_acc[...] = jnp.zeros(mse_acc.shape, jnp.float32)

    # Upcast to f32 BEFORE the temperature scale / exp; temperatures folded
    # into multiplies (no full-tile divides).
    s = s_ref[...].astype(jnp.float32) * inv_student_temp                 # (rb, dk)
    t = (t_ref[...].astype(jnp.float32)
         - c_ref[...].astype(jnp.float32)) * inv_teacher_temp             # (rb, dk)

    # ---- online logsumexp over D for the student logits
    m_s_new = jnp.maximum(m_s[...], jnp.max(s, axis=-1, keepdims=True))
    l_s[...] = (l_s[...] * jnp.exp(m_s[...] - m_s_new)
                + jnp.sum(jnp.exp(s - m_s_new), axis=-1, keepdims=True))
    m_s[...] = m_s_new

    # ---- online teacher softmax stats + exp(t)-weighted student-logit sum
    m_t_new = jnp.maximum(m_t[...], jnp.max(t, axis=-1, keepdims=True))
    alpha = jnp.exp(m_t[...] - m_t_new)
    p = jnp.exp(t - m_t_new)
    l_t[...] = l_t[...] * alpha + jnp.sum(p, axis=-1, keepdims=True)
    w_acc[...] = w_acc[...] * alpha + jnp.sum(p * s, axis=-1, keepdims=True)
    m_t[...] = m_t_new

    # ---- register consistency: per-row partial sum of squared diffs
    diff = sr_ref[...].astype(jnp.float32) - tr_ref[...].astype(jnp.float32)
    mse_acc[...] += jnp.sum(diff * diff, axis=-1, keepdims=True)

    @pl.when(d == nd - 1)
    def _finalize():
        # ce_row = logsumexp(s) - sum_j softmax(t)_j * s_j
        ce_ref[...] = (m_s[...] + jnp.log(l_s[...])
                       - w_acc[...] * pl.reciprocal(l_t[...], approx=False))
        mse_ref[...] = mse_acc[...]


def _round_up(x, m):
    return (x + m - 1) // m * m


def _vmem_capacity_bytes():
    try:
        return int(pltpu.get_tpu_info().vmem_capacity_bytes)
    except Exception:
        return 64 << 20          # conservative fallback (v7x per-TensorCore)


def _pick_tiles(B, N, D, itemsize, row_tile, d_tile, step_budget):
    """Pick (rb, dk, n_d).  D is later padded to n_d*dk, B to a multiple of rb.
    rb honors (8,128)/(16,128) tiling (16 sublanes for packed bf16)."""
    sub = 16 if itemsize < 4 else 8
    rb = row_tile if row_tile is not None else sub

    dk_full = _round_up(max(D, 1), 128)
    if d_tile is not None:
        dk = _round_up(d_tile, 128)
        n_d = pl.cdiv(dk_full, dk)
    else:
        # bytes fetched per D-column per grid step (student+teacher+regs+center)
        per_col = itemsize * (2 * rb * (1 + N) + 1)
        dk_cap = max(128, (step_budget // max(per_col, 1)) // 128 * 128)
        n_d = pl.cdiv(dk_full, dk_cap)
        dk = _round_up(pl.cdiv(dk_full, n_d), 128)   # even split, minimal padding

    if row_tile is None and n_d == 1:
        # Whole D fits in one chunk -> spend leftover budget on more rows,
        # keeping >=2 row tiles when B allows so both v7x TensorCores work.
        # TODO(synk): for tiny B with n_d>1 a per-core D split would be needed
        # to keep both v7x cores busy; not implemented here.
        per_row = itemsize * dk * 2 * (1 + N)
        rows_fit = max(sub, (step_budget // max(per_row, 1)) // sub * sub)
        if B >= 2 * sub:
            rows_cap = max(sub, (B // 2) // sub * sub)
        else:
            rows_cap = _round_up(B, sub)
        rb = min(rows_fit, rows_cap)
    return rb, dk, n_d


def dino_loss(student_output, teacher_output, s_reg, t_reg, center,
              *, student_temp=0.1, teacher_temp=0.04, reg_weight=0.1,
              stream_dtype=None, row_tile=None, d_tile=None):
    """Pallas implementation of DINOLoss.forward. Returns a scalar float32.

    stream_dtype: optional dtype (e.g. jnp.bfloat16) to cast the four large
    operands to before streaming them through the kernel (halves HBM bytes);
    all arithmetic remains float32.
    """
    B, D = student_output.shape
    _, N, _ = s_reg.shape

    if stream_dtype is not None:
        student_output = student_output.astype(stream_dtype)
        teacher_output = teacher_output.astype(stream_dtype)
        s_reg = s_reg.astype(stream_dtype)
        t_reg = t_reg.astype(stream_dtype)

    itemsize = jnp.dtype(student_output.dtype).itemsize
    vmem_cap = _vmem_capacity_bytes()
    if vmem_cap >= (100 << 20):          # v6e / v5e: 128 MiB physical VMEM
        step_budget = 16 << 20
    elif vmem_cap >= (48 << 20):         # v7x: 64 MiB per TensorCore
        step_budget = 12 << 20
    else:
        step_budget = 4 << 20

    rb, dk, n_d = _pick_tiles(B, N, D, itemsize, row_tile, d_tile, step_budget)

    B_pad = _round_up(B, rb)
    D_pad = n_d * dk
    pad_r = B_pad - B
    pad_c = D_pad - D

    def pad_logits(x):
        if pad_c:
            x = jnp.pad(x, ((0, 0), (0, pad_c)), constant_values=_NEG_PAD)
        if pad_r:
            x = jnp.pad(x, ((0, pad_r), (0, 0)))
        return x

    def pad_reg(x):
        if pad_c:
            x = jnp.pad(x, ((0, 0), (0, 0), (0, pad_c)))
        if pad_r:
            x = jnp.pad(x, ((0, pad_r), (0, 0), (0, 0)))
        return x.reshape(-1, D_pad)

    s2d = pad_logits(student_output)
    t2d = pad_logits(teacher_output)
    c2d = jnp.pad(center, ((0, 0), (0, pad_c))) if pad_c else center
    sr = pad_reg(s_reg)                       # (B_pad*N, D_pad)
    tr = pad_reg(t_reg)

    n_row = B_pad // rb
    rn = rb * N
    R_pad = B_pad * N

    # Explicit VMEM limit from the actual chosen tiles (don't rely on the
    # generation-specific scoped-VMEM default).
    c_itemsize = jnp.dtype(center.dtype).itemsize
    step_in_bytes = itemsize * dk * (2 * rb + 2 * rn) + c_itemsize * dk
    vmem_limit = 2 * step_in_bytes + (16 << 20)           # dbl-buffer + headroom
    vmem_limit = int(min(max(vmem_limit, 32 << 20), int(vmem_cap * 0.9)))

    kernel = functools.partial(
        _dino_loss_kernel,
        inv_student_temp=1.0 / float(student_temp),
        inv_teacher_temp=1.0 / float(teacher_temp),
    )

    ce_rows, mse_rows = pl.pallas_call(
        kernel,
        out_shape=(
            jax.ShapeDtypeStruct((B_pad, 1), jnp.float32),   # per-row CE
            jax.ShapeDtypeStruct((R_pad, 1), jnp.float32),   # per-reg-row MSE sum
        ),
        grid_spec=pltpu.PrefetchScalarGridSpec(
            num_scalar_prefetch=0,
            grid=(n_row, n_d),
            in_specs=[
                pl.BlockSpec((rb, dk), lambda r, d: (r, d)),   # student
                pl.BlockSpec((rb, dk), lambda r, d: (r, d)),   # teacher
                pl.BlockSpec((1, dk), lambda r, d: (0, d)),    # center
                pl.BlockSpec((rn, dk), lambda r, d: (r, d)),   # s_reg (flat)
                pl.BlockSpec((rn, dk), lambda r, d: (r, d)),   # t_reg (flat)
            ],
            out_specs=[
                pl.BlockSpec((rb, 1), lambda r, d: (r, 0)),
                pl.BlockSpec((rn, 1), lambda r, d: (r, 0)),
            ],
            scratch_shapes=[
                pltpu.VMEM((rb, 1), jnp.float32),   # m_s
                pltpu.VMEM((rb, 1), jnp.float32),   # l_s
                pltpu.VMEM((rb, 1), jnp.float32),   # m_t
                pltpu.VMEM((rb, 1), jnp.float32),   # l_t
                pltpu.VMEM((rb, 1), jnp.float32),   # w_acc
                pltpu.VMEM((rn, 1), jnp.float32),   # mse_acc
            ],
        ),
        compiler_params=pltpu.CompilerParams(
            dimension_semantics=("parallel", "arbitrary"),
            vmem_limit_bytes=vmem_limit),
    )(s2d, t2d, c2d, sr, tr)

    # Padded rows contribute exactly 0 to the MSE partials; CE pad rows sliced.
    ce = jnp.sum(ce_rows[:B, 0]) / B
    mse = jnp.sum(mse_rows) / (B * N * D)
    return ce + reg_weight * mse


def _reference(student_output, teacher_output, s_reg, t_reg, center,
               student_temp=0.1, teacher_temp=0.04, reg_weight=0.1):
    s = student_output / student_temp
    t = (teacher_output - center) / teacher_temp
    s_logp = jax.nn.log_softmax(s, axis=-1)
    t_probs = jax.nn.softmax(t, axis=-1)
    loss = -jnp.mean(jnp.sum(t_probs * s_logp, axis=-1))
    reg_loss = jnp.mean((s_reg - t_reg) ** 2)
    return loss + reg_weight * reg_loss


if __name__ == "__main__":
    key = jax.random.PRNGKey(0)
    k1, k2, k3, k4, k5, k6, k7, k8 = jax.random.split(key, 8)

    # Case 1: f32 inputs, forced (8, 128) tiles -> exercises the multi-chunk
    # online-softmax / resident-accumulator path with a 2x4 grid.
    B, D, N = 16, 512, 4
    student = jax.random.normal(k1, (B, D), dtype=jnp.float32)
    teacher = jax.random.normal(k2, (B, D), dtype=jnp.float32)
    s_reg = jax.random.normal(k3, (B, N, D), dtype=jnp.float32)
    t_reg = jax.random.normal(k4, (B, N, D), dtype=jnp.float32)
    center = jnp.zeros((1, D), dtype=jnp.float32)   # matches zeros(1, output_dim)

    out = dino_loss(student, teacher, s_reg, t_reg, center,
                    row_tile=8, d_tile=128)
    out = jax.block_until_ready(out)
    ref = _reference(student, teacher, s_reg, t_reg, center)
    assert jnp.allclose(out, ref, rtol=2e-5, atol=2e-5), (out, ref)

    # Case 2: bf16 streaming + unaligned shapes (B=10, D=300) -> exercises the
    # wrapper-side row/column padding path and the packed (16,128) tiling.
    B2, D2, N2 = 10, 300, 3
    student2 = jax.random.normal(k5, (B2, D2), dtype=jnp.float32)
    teacher2 = jax.random.normal(k6, (B2, D2), dtype=jnp.float32)
    s_reg2 = jax.random.normal(k7, (B2, N2, D2), dtype=jnp.float32)
    t_reg2 = jax.random.normal(k8, (B2, N2, D2), dtype=jnp.float32)
    center2 = jnp.zeros((1, D2), dtype=jnp.float32)

    out2 = dino_loss(student2, teacher2, s_reg2, t_reg2, center2,
                     stream_dtype=jnp.bfloat16, d_tile=128)
    out2 = jax.block_until_ready(out2)
    # Reference sees the same bf16-rounded operands the kernel streams.
    ref2 = _reference(student2.astype(jnp.bfloat16).astype(jnp.float32),
                      teacher2.astype(jnp.bfloat16).astype(jnp.float32),
                      s_reg2.astype(jnp.bfloat16).astype(jnp.float32),
                      t_reg2.astype(jnp.bfloat16).astype(jnp.float32),
                      center2)
    assert jnp.allclose(out2, ref2, rtol=1e-3, atol=1e-3), (out2, ref2)

    print("KERNEL_OK")
</pallas_src>

<mosaic_0001>
module attributes {stable_mosaic.version = 11 : i64} {
  func.func @_dino_loss_kernel(%arg0: i32, %arg1: i32, %arg2: memref<8x128xf32, #tpu.memory_space<vmem>>, %arg3: memref<8x128xf32, #tpu.memory_space<vmem>>, %arg4: memref<1x128xf32, #tpu.memory_space<vmem>>, %arg5: memref<32x128xf32, #tpu.memory_space<vmem>>, %arg6: memref<32x128xf32, #tpu.memory_space<vmem>>, %arg7: memref<8x1xf32, #tpu.memory_space<vmem>>, %arg8: memref<32x1xf32, #tpu.memory_space<vmem>>, %arg9: memref<8x1xf32, #tpu.memory_space<vmem>>, %arg10: memref<8x1xf32, #tpu.memory_space<vmem>>, %arg11: memref<8x1xf32, #tpu.memory_space<vmem>>, %arg12: memref<8x1xf32, #tpu.memory_space<vmem>>, %arg13: memref<8x1xf32, #tpu.memory_space<vmem>>, %arg14: memref<32x1xf32, #tpu.memory_space<vmem>>) attributes {dimension_semantics = [#tpu.dimension_semantics<parallel>, #tpu.dimension_semantics<arbitrary>], iteration_bounds = array<i64: 2, 4>, scalar_prefetch = 0 : i64, scratch_operands = 6 : i64, tpu.core_type = #tpu.core_type<tc>, window_params = [{transform_indices = @transform_0, window_bounds = array<i64: 8, 128>}, {transform_indices = @transform_1, window_bounds = array<i64: 8, 128>}, {transform_indices = @transform_2, window_bounds = array<i64: 1, 128>}, {transform_indices = @transform_3, window_bounds = array<i64: 32, 128>}, {transform_indices = @transform_4, window_bounds = array<i64: 32, 128>}, {transform_indices = @transform_5, window_bounds = array<i64: 8, 1>}, {transform_indices = @transform_6, window_bounds = array<i64: 32, 1>}]} {
    %c0_i32 = arith.constant 0 : i32
    %0 = arith.cmpi eq, %arg1, %c0_i32 : i32
    %1 = arith.extui %0 : i1 to i32
    %c0_i32_0 = arith.constant 0 : i32
    %2 = arith.cmpi ne, %1, %c0_i32_0 : i32
    scf.if %2 {
      %cst_46 = arith.constant 0xFF800000 : f32
      %65 = vector.broadcast %cst_46 : f32 to vector<8x1xf32>
      %c0_47 = arith.constant 0 : index
      %c0_48 = arith.constant 0 : index
      %66 = vector.load %arg9[%c0_47, %c0_48] : memref<8x1xf32, #tpu.memory_space<vmem>>, vector<8x1xf32>
      tpu.vector_store %arg9[%c0_47, %c0_48], %65 {strides = array<i32>} : memref<8x1xf32, #tpu.memory_space<vmem>>, vector<8x1xf32>,
      %c0_49 = arith.constant 0 : index
      %c0_50 = arith.constant 0 : index
      %67 = vector.load %arg11[%c0_49, %c0_50] : memref<8x1xf32, #tpu.memory_space<vmem>>, vector<8x1xf32>
      tpu.vector_store %arg11[%c0_49, %c0_50], %65 {strides = array<i32>} : memref<8x1xf32, #tpu.memory_space<vmem>>, vector<8x1xf32>,
      %cst_51 = arith.constant 0.000000e+00 : f32
      %68 = vector.broadcast %cst_51 : f32 to vector<8x1xf32>
      %c0_52 = arith.constant 0 : index
      %c0_53 = arith.constant 0 : index
      %69 = vector.load %arg10[%c0_52, %c0_53] : memref<8x1xf32, #tpu.memory_space<vmem>>, vector<8x1xf32>
      tpu.vector_store %arg10[%c0_52, %c0_53], %68 {strides = array<i32>} : memref<8x1xf32, #tpu.memory_space<vmem>>, vector<8x1xf32>,
      %cst_54 = arith.constant 0.000000e+00 : f32
      %70 = vector.broadcast %cst_54 : f32 to vector<8x1xf32>
      %c0_55 = arith.constant 0 : index
      %c0_56 = arith.constant 0 : index
      %71 = vector.load %arg12[%c0_55, %c0_56] : memref<8x1xf32, #tpu.memory_space<vmem>>, vector<8x1xf32>
      tpu.vector_store %arg12[%c0_55, %c0_56], %70 {strides = array<i32>} : memref<8x1xf32, #tpu.memory_space<vmem>>, vector<8x1xf32>,
      %cst_57 = arith.constant 0.000000e+00 : f32
      %72 = vector.broadcast %cst_57 : f32 to vector<8x1xf32>
      %c0_58 = arith.constant 0 : index
      %c0_59 = arith.constant 0 : index
      %73 = vector.load %arg13[%c0_58, %c0_59] : memref<8x1xf32, #tpu.memory_space<vmem>>, vector<8x1xf32>
      tpu.vector_store %arg13[%c0_58, %c0_59], %72 {strides = array<i32>} : memref<8x1xf32, #tpu.memory_space<vmem>>, vector<8x1xf32>,
      %cst_60 = arith.constant 0.000000e+00 : f32
      %74 = vector.broadcast %cst_60 : f32 to vector<32x1xf32>
      %c0_61 = arith.constant 0 : index
      %c0_62 = arith.constant 0 : index
      %75 = vector.load %arg14[%c0_61, %c0_62] : memref<32x1xf32, #tpu.memory_space<vmem>>, vector<32x1xf32>
      tpu.vector_store %arg14[%c0_61, %c0_62], %74 {strides = array<i32>} : memref<32x1xf32, #tpu.memory_space<vmem>>, vector<32x1xf32>,
    } else {
    }
    %c0 = arith.constant 0 : index
    %c0_1 = arith.constant 0 : index
    %3 = vector.load %arg2[%c0, %c0_1] : memref<8x128xf32, #tpu.memory_space<vmem>>, vector<8x128xf32>
    %cst = arith.constant 1.000000e+01 : f32
    %4 = vector.broadcast %cst : f32 to vector<8x128xf32>
    %5 = arith.mulf %3, %4 : vector<8x128xf32>
    %c0_2 = arith.constant 0 : index
    %c0_3 = arith.constant 0 : index
    %6 = vector.load %arg3[%c0_2, %c0_3] : memref<8x128xf32, #tpu.memory_space<vmem>>, vector<8x128xf32>
    %c0_4 = arith.constant 0 : index
    %c0_5 = arith.constant 0 : index
    %7 = vector.load %arg4[%c0_4, %c0_5] : memref<1x128xf32, #tpu.memory_space<vmem>>, vector<1x128xf32>
    %8 = vector.broadcast %7 : vector<1x128xf32> to vector<8x128xf32>
    %9 = arith.subf %6, %8 : vector<8x128xf32>
    %cst_6 = arith.constant 2.500000e+01 : f32
    %10 = vector.broadcast %cst_6 : f32 to vector<8x128xf32>
    %11 = arith.mulf %9, %10 : vector<8x128xf32>
    %c0_7 = arith.constant 0 : index
    %c0_8 = arith.constant 0 : index
    %12 = vector.load %arg9[%c0_7, %c0_8] : memref<8x1xf32, #tpu.memory_space<vmem>>, vector<8x1xf32>
    %cst_9 = arith.constant dense<0xFF800000> : vector<8xf32>
    %13 = vector.multi_reduction <maximumf>, %5, %cst_9 [1] : vector<8x128xf32> to vector<8xf32>
    %14 = vector.shape_cast %13 : vector<8xf32> to vector<8x1xf32>
    %15 = arith.maximumf %12, %14 : vector<8x1xf32>
    %c0_10 = arith.constant 0 : index
    %c0_11 = arith.constant 0 : index
    %16 = vector.load %arg10[%c0_10, %c0_11] : memref<8x1xf32, #tpu.memory_space<vmem>>, vector<8x1xf32>
    %c0_12 = arith.constant 0 : index
    %c0_13 = arith.constant 0 : index
    %17 = vector.load %arg9[%c0_12, %c0_13] : memref<8x1xf32, #tpu.memory_space<vmem>>, vector<8x1xf32>
    %18 = arith.subf %17, %15 : vector<8x1xf32>
    %19 = math.exp %18 : vector<8x1xf32>
    %20 = arith.mulf %16, %19 : vector<8x1xf32>
    %21 = vector.broadcast %15 : vector<8x1xf32> to vector<8x128xf32>
    %22 = arith.subf %5, %21 : vector<8x128xf32>
    %23 = math.exp %22 : vector<8x128xf32>
    %cst_14 = arith.constant dense<0.000000e+00> : vector<8xf32>
    %24 = vector.multi_reduction <add>, %23, %cst_14 [1] : vector<8x128xf32> to vector<8xf32>
    %25 = vector.shape_cast %24 : vector<8xf32> to vector<8x1xf32>
    %26 = arith.addf %20, %25 : vector<8x1xf32>
    %c0_15 = arith.constant 0 : index
    %c0_16 = arith.constant 0 : index
    %27 = vector.load %arg10[%c0_15, %c0_16] : memref<8x1xf32, #tpu.memory_space<vmem>>, vector<8x1xf32>
    tpu.vector_store %arg10[%c0_15, %c0_16], %26 {strides = array<i32>} : memref<8x1xf32, #tpu.memory_space<vmem>>, vector<8x1xf32>,
    %c0_17 = arith.constant 0 : index
    %c0_18 = arith.constant 0 : index
    %28 = vector.load %arg9[%c0_17, %c0_18] : memref<8x1xf32, #tpu.memory_space<vmem>>, vector<8x1xf32>
    tpu.vector_store %arg9[%c0_17, %c0_18], %15 {strides = array<i32>} : memref<8x1xf32, #tpu.memory_space<vmem>>, vector<8x1xf32>,
    %c0_19 = arith.constant 0 : index
    %c0_20 = arith.constant 0 : index
    %29 = vector.load %arg11[%c0_19, %c0_20] : memref<8x1xf32, #tpu.memory_space<vmem>>, vector<8x1xf32>
    %cst_21 = arith.constant dense<0xFF800000> : vector<8xf32>
    %30 = vector.multi_reduction <maximumf>, %11, %cst_21 [1] : vector<8x128xf32> to vector<8xf32>
    %31 = vector.shape_cast %30 : vector<8xf32> to vector<8x1xf32>
    %32 = arith.maximumf %29, %31 : vector<8x1xf32>
    %c0_22 = arith.constant 0 : index
    %c0_23 = arith.constant 0 : index
    %33 = vector.load %arg11[%c0_22, %c0_23] : memref<8x1xf32, #tpu.memory_space<vmem>>, vector<8x1xf32>
    %34 = arith.subf %33, %32 : vector<8x1xf32>
    %35 = math.exp %34 : vector<8x1xf32>
    %36 = vector.broadcast %32 : vector<8x1xf32> to vector<8x128xf32>
    %37 = arith.subf %11, %36 : vector<8x128xf32>
    %38 = math.exp %37 : vector<8x128xf32>
    %c0_24 = arith.constant 0 : index
    %c0_25 = arith.constant 0 : index
    %39 = vector.load %arg12[%c0_24, %c0_25] : memref<8x1xf32, #tpu.memory_space<vmem>>, vector<8x1xf32>
    %40 = arith.mulf %39, %35 : vector<8x1xf32>
    %cst_26 = arith.constant dense<0.000000e+00> : vector<8xf32>
    %41 = vector.multi_reduction <add>, %38, %cst_26 [1] : vector<8x128xf32> to vector<8xf32>
    %42 = vector.shape_cast %41 : vector<8xf32> to vector<8x1xf32>
    %43 = arith.addf %40, %42 : vector<8x1xf32>
    %c0_27 = arith.constant 0 : index
    %c0_28 = arith.constant 0 : index
    %44 = vector.load %arg12[%c0_27, %c0_28] : memref<8x1xf32, #tpu.memory_space<vmem>>, vector<8x1xf32>
    tpu.vector_store %arg12[%c0_27, %c0_28], %43 {strides = array<i32>} : memref<8x1xf32, #tpu.memory_space<vmem>>, vector<8x1xf32>,
    %c0_29 = arith.constant 0 : index
    %c0_30 = arith.constant 0 : index
    %45 = vector.load %arg13[%c0_29, %c0_30] : memref<8x1xf32, #tpu.memory_space<vmem>>, vector<8x1xf32>
    %46 = arith.mulf %45, %35 : vector<8x1xf32>
    %47 = arith.mulf %38, %5 : vector<8x128xf32>
    %cst_31 = arith.constant dense<0.000000e+00> : vector<8xf32>
    %48 = vector.multi_reduction <add>, %47, %cst_31 [1] : vector<8x128xf32> to vector<8xf32>
    %49 = vector.shape_cast %48 : vector<8xf32> to vector<8x1xf32>
    %50 = arith.addf %46, %49 : vector<8x1xf32>
    %c0_32 = arith.constant 0 : index
    %c0_33 = arith.constant 0 : index
    %51 = vector.load %arg13[%c0_32, %c0_33] : memref<8x1xf32, #tpu.memory_space<vmem>>, vector<8x1xf32>
    tpu.vector_store %arg13[%c0_32, %c0_33], %50 {strides = array<i32>} : memref<8x1xf32, #tpu.memory_space<vmem>>, vector<8x1xf32>,
    %c0_34 = arith.constant 0 : index
    %c0_35 = arith.constant 0 : index
    %52 = vector.load %arg11[%c0_34, %c0_35] : memref<8x1xf32, #tpu.memory_space<vmem>>, vector<8x1xf32>
    tpu.vector_store %arg11[%c0_34, %c0_35], %32 {strides = array<i32>} : memref<8x1xf32, #tpu.memory_space<vmem>>, vector<8x1xf32>,
    %c0_36 = arith.constant 0 : index
    %c0_37 = arith.constant 0 : index
    %53 = vector.load %arg5[%c0_36, %c0_37] : memref<32x128xf32, #tpu.memory_space<vmem>>, vector<32x128xf32>
    %c0_38 = arith.constant 0 : index
    %c0_39 = arith.constant 0 : index
    %54 = vector.load %arg6[%c0_38, %c0_39] : memref<32x128xf32, #tpu.memory_space<vmem>>, vector<32x128xf32>
    %55 = arith.subf %53, %54 : vector<32x128xf32>
    %c0_40 = arith.constant 0 : index
    %c0_41 = arith.constant 0 : index
    %56 = vector.load %arg14[%c0_40, %c0_41] : memref<32x1xf32, #tpu.memory_space<vmem>>, vector<32x1xf32>
    %57 = arith.mulf %55, %55 : vector<32x128xf32>
    %cst_42 = arith.constant dense<0.000000e+00> : vector<32xf32>
    %58 = vector.multi_reduction <add>, %57, %cst_42 [1] : vector<32x128xf32> to vector<32xf32>
    %59 = vector.shape_cast %58 : vector<32xf32> to vector<32x1xf32>
    %60 = arith.addf %56, %59 : vector<32x1xf32>
    %c0_43 = arith.constant 0 : index
    %c0_44 = arith.constant 0 : index
    %61 = vector.load %arg14[%c0_43, %c0_44] : memref<32x1xf32, #tpu.memory_space<vmem>>, vector<32x1xf32>
    tpu.vector_store %arg14[%c0_43, %c0_44], %60 {strides = array<i32>} : memref<32x1xf32, #tpu.memory_space<vmem>>, vector<32x1xf32>,
    %c3_i32 = arith.constant 3 : i32
    %62 = arith.cmpi eq, %arg1, %c3_i32 : i32
    %63 = arith.extui %62 : i1 to i32
    %c0_i32_45 = arith.constant 0 : i32
    %64 = arith.cmpi ne, %63, %c0_i32_45 : i32
    scf.if %64 {
      %c0_46 = arith.constant 0 : index
      %c0_47 = arith.constant 0 : index
      %65 = vector.load %arg9[%c0_46, %c0_47] : memref<8x1xf32, #tpu.memory_space<vmem>>, vector<8x1xf32>
      %c0_48 = arith.constant 0 : index
      %c0_49 = arith.constant 0 : index
      %66 = vector.load %arg10[%c0_48, %c0_49] : memref<8x1xf32, #tpu.memory_space<vmem>>, vector<8x1xf32>
      %67 = math.log %66 : vector<8x1xf32>
      %68 = arith.addf %65, %67 : vector<8x1xf32>
      %c0_50 = arith.constant 0 : index
      %c0_51 = arith.constant 0 : index
      %69 = vector.load %arg13[%c0_50, %c0_51] : memref<8x1xf32, #tpu.memory_space<vmem>>, vector<8x1xf32>
      %c0_52 = arith.constant 0 : index
      %c0_53 = arith.constant 0 : index
      %70 = vector.load %arg12[%c0_52, %c0_53] : memref<8x1xf32, #tpu.memory_space<vmem>>, vector<8x1xf32>
      %71 = tpu.reciprocal %70 : vector<8x1xf32> -> vector<8x1xf32>
      %72 = arith.mulf %69, %71 : vector<8x1xf32>
      %73 = arith.subf %68, %72 : vector<8x1xf32>
      %c0_54 = arith.constant 0 : index
      %c0_55 = arith.constant 0 : index
      %74 = vector.load %arg7[%c0_54, %c0_55] : memref<8x1xf32, #tpu.memory_space<vmem>>, vector<8x1xf32>
      tpu.vector_store %arg7[%c0_54, %c0_55], %73 {strides = array<i32>} : memref<8x1xf32, #tpu.memory_space<vmem>>, vector<8x1xf32>,
      %c0_56 = arith.constant 0 : index
      %c0_57 = arith.constant 0 : index
      %75 = vector.load %arg14[%c0_56, %c0_57] : memref<32x1xf32, #tpu.memory_space<vmem>>, vector<32x1xf32>
      %c0_58 = arith.constant 0 : index
      %c0_59 = arith.constant 0 : index
      %76 = vector.load %arg8[%c0_58, %c0_59] : memref<32x1xf32, #tpu.memory_space<vmem>>, vector<32x1xf32>
      tpu.vector_store %arg8[%c0_58, %c0_59], %75 {strides = array<i32>} : memref<32x1xf32, #tpu.memory_space<vmem>>, vector<32x1xf32>,
    } else {
    }
    return
  }
  func.func @transform_0(%arg0: i32, %arg1: i32) -> (i32, i32) {
    %c0_i32 = arith.constant 0 : i32
    return %arg0, %arg1 : i32, i32
  }
  func.func @transform_1(%arg0: i32, %arg1: i32) -> (i32, i32) {
    %c0_i32 = arith.constant 0 : i32
    return %arg0, %arg1 : i32, i32
  }
  func.func @transform_2(%arg0: i32, %arg1: i32) -> (i32, i32) {
    %c0_i32 = arith.constant 0 : i32
    %c0_i32_0 = arith.constant 0 : i32
    return %c0_i32, %arg1 : i32, i32
  }
  func.func @transform_3(%arg0: i32, %arg1: i32) -> (i32, i32) {
    %c0_i32 = arith.constant 0 : i32
    return %arg0, %arg1 : i32, i32
  }
  func.func @transform_4(%arg0: i32, %arg1: i32) -> (i32, i32) {
    %c0_i32 = arith.constant 0 : i32
    return %arg0, %arg1 : i32, i32
  }
  func.func @transform_5(%arg0: i32, %arg1: i32) -> (i32, i32) {
    %c0_i32 = arith.constant 0 : i32
    %c0_i32_0 = arith.constant 0 : i32
    return %arg0, %c0_i32 : i32, i32
  }
  func.func @transform_6(%arg0: i32, %arg1: i32) -> (i32, i32) {
    %c0_i32 = arith.constant 0 : i32
    %c0_i32_0 = arith.constant 0 : i32
    return %arg0, %c0_i32 : i32, i32
  }
}

</mosaic_0001>

<bundles_post_ra>
// kernel: tpu_custom_call.1
= control target key start
LH: loop header
LB: loop body
LE: loop exit
PB: predicated region body
PF: predicated region fallthrough
CT: control target
= control target key end

     0   :  { %s1609_s0 = inlined_call_operand.hbm [shape: f32[16,512], index: 0, kind: input, shape index: {}]   ;;  %s1610_s1 = inlined_call_operand.hbm [shape: f32[16,512], index: 1, kind: input, shape index: {}]   ;;  %s1611_s2 = inlined_call_operand.hbm [shape: f32[1,512], index: 2, kind: input, shape index: {}]   ;;  %s1612_s3 = inlined_call_operand.hbm [shape: f32[64,512], index: 3, kind: input, shape index: {}]   ;;  %s1613_s4 = inlined_call_operand.hbm [shape: f32[64,512], index: 4, kind: input, shape index: {}]   ;;  %s1614_s5 = inlined_call_operand.vmem [shape: f32[16,1], index: 5, kind: output, shape index: {0}]   ;;  %s1615_s6 = inlined_call_operand.vmem [shape: f32[64,1], index: 6, kind: output, shape index: {1}]  }
   0x1   :  { %1631 = sst [smem:[#allocation32_spill]] %s1610_s1 }
   0x2   :  { %1632 = sst [smem:[#allocation33_spill]] %s1611_s2 }
   0x3   :  { %1633 = sst [smem:[#allocation34_spill]] %s1612_s3 }
   0x4   :  { %1634 = sst [smem:[#allocation35_spill]] %s1614_s5 }
   0x5   :  { %1635 = sst [smem:[#allocation36_spill]] %s1615_s6 }
   0x6   :  { %12 = vsyncpa [#allocation9], 0 }
   0x7   :  { %14 = vsyncpa [#allocation9 + $0x1], 0 }
   0x8   :  { %15 = vsyncpa [#allocation11], 0 }
   0x9   :  { %17 = vsyncpa [#allocation11 + $0x1], 0 }
   0xa   :  { %18 = vsyncpa [#allocation14], 0 }
   0xb   :  { %20 = vsyncpa [#allocation14 + $0x1], 0  ;;  %s1253_s21 = smov 0   ;;  %s1255_s22 = smov 0  }
   0xc   :  { %s1257_s23 = smov 0   ;;  %s1259_s24 = smov 0  }
   0xd   :  { %s1261_s25 = smov 0   ;;  %s1263_s26 = smov 0  }
   0xe   :  { %s1265_s27 = smov 0   ;;  %s1267_s28 = smov 0  }
   0xf   :  { %s1269_s29 = smov 0   ;;  %s1271_s30 = smov 0  }
  0x10   :  { %s1273_s7 = smov 0  }
  0x11 LB: > { %1636 = sst [smem:[#allocation20_spill]] %s1181_s25  ;;  %s1616_s8 = sadd.s32 4294967295, %s1205_s7   ;;  %s1205_s7 = sphi %s1273_s7, %s26_s7   ;;  %s1201_s30 = sphi %s1271_s30, %s1685_s30   ;;  %s1197_s29 = sphi %s1269_s29, %s1684_s29   ;;  %s1193_s28 = sphi %s1267_s28, %s1677_s28   ;;  %s1189_s27 = sphi %s1265_s27, %s1683_s27   ;;  %s1185_s26 = sphi %s1263_s26, %s1676_s26   ;;  %s1181_s25 = sphi %s1261_s25, %s1675_s25   ;;  %s1177_s24 = sphi %s1259_s24, %s1674_s24   ;;  %s1173_s23 = sphi %s1257_s23, %s1682_s23   ;;  %s1169_s22 = sphi %s1255_s22, %s1681_s22   ;;  %s1165_s21 = sphi %s1253_s21, %s1680_s21  }
  0x12   : > { %1637 = sst [smem:[#allocation21_spill]] %s1185_s26  ;;  %s35_s9 = sadd.s32 1, %s1197_s29 }
  0x13   : > { %1638 = sst [smem:[#allocation22_spill]] %s1189_s27  ;;  %p36_p0 = scmp.ge.s32.totalorder %s35_s9, 4 }
  0x14   : > { %1639 = sst [smem:[#allocation23_spill]] %s1193_s28  ;;  %s38_s10 = sadd.s32 1, %s1201_s30 }
  0x15   : > { %1640 = sst [smem:[#allocation24_spill]] %s1201_s30  ;;  %s47_s11 = sadd.s32 1, %s1185_s26 }
  0x16   : > { %p54_p1 = scmp.ne.s32.totalorder %s1185_s26, %s1181_s25  ;;  %s1687_s9 = smov (%p36_p0, %s35_s9), 0 }
  0x17   : > { %1641 = sst [smem:[#allocation25_spill]] %s1687_s9  ;;  %s1689_s10 = smov (!%p36_p0, %s38_s10), %s1201_s30 }
  0x18   : > { %s1317_s12 = ssub.s32 %s1197_s29, %s1687_s9  ;;  %p55_p2 = scmp.eq.s32.totalorder %s1205_s7, 0 }
  0x19   : > { %p40_p3 = scmp.ge.s32.totalorder %s1689_s10, 2  ;;  %p60_p4 = scmp.ne.s32.totalorder %s1181_s25, %s1177_s24 }
  0x1a   : > { %p1323_p5 = por %p55_p2, %p54_p1  ;;  %p1329_p6 = scmp.eq.s32.totalorder %s1616_s8, 0 }
  0x1b   : > { %s1691_s10 = smov (%p40_p3, %s1689_s10), 0  ;;  %p99_p8 = scmp.eq.s32.totalorder %s1317_s12, 0 }
  0x1c   : > { %1644 = sst [smem:[#allocation26_spill]] %s1691_s10  ;;  %p1337_p7 = por %p1329_p6, %p60_p4 }
  0x1d   : > { %s42_s16 = ssub.s32 %s1201_s30, %s1691_s10  ;;  %p1625_p9 = scmp.lt.s32.totalorder %s1205_s7, 8 }
  0x1e   : > { %s1645_s15 = scalar_select %p1337_p7, 1, 0 }
  0x1f   : > { %s44_s17 = sor.u32 %s1317_s12, %s42_s16  ;;  %s1347_s18 = sand.u32 1, %s1185_s26  }
  0x20   : > { %1646 = sst [smem:[#allocation27_spill]] %s1645_s15  ;;  %p45_p10 = scmp.eq.s32.totalorder %s44_s17, 0 }
  0x21   : > { %s799_s20 = sshll.u32 %s1201_s30, 2  ;;  %p1361_p11 = pnand %p1625_p9, %p1323_p5 }
  0x22   : > { %s1352_s24 = scalar_select %p45_p10, %s1185_s26, %s47_s11  }
  0x23   : > { %s1355_s8 = sadd.s32 %s1197_s29, %s799_s20  ;;  %s266_s10 = sand.u32 1, %s1205_s7  }
  0x24   : > { %1647 = sst [smem:[#allocation28_spill]] %s1352_s24  ;;  %s1621_s17 = sshll.u32 %s1355_s8, 7 }
  0x25   : > { %s1649_s1 = sld [smem:[#allocation32_spill]]  ;;  %s1650_s24 = sshll.u32 %s1347_s18, 3 }
  0x26   : > { %s270_s20 = scalar_lea.vmem [#allocation10], %s1650_s24  ;;  %s805_s13 = sshll.u32 %s1347_s18, 5 }
  0x27   : > { %s279_s26 = sshll.u32 %s270_s20, 4  ;;  %s1377_s27 = scalar_lea.sflag [#allocation11], %s266_s10  ;;  %s280_s26 = int_to_ptr.vmem [resolvable:$true] %s279_s26 }
  0x28   : > { %1651 = sst [smem:[#allocation29_spill]] %s1377_s27  ;;  %p965_p12 = pneg %p1361_p11 }
  0x29   : > { %s976_s6 = scalar_lea.vmem %s280_s26, 128  ;;  %s1207_s5 = smov [#allocation10]  }
  0x2a   : > { %p977_p13 = scmp.ne.s32.totalorder %s280_s26, %s976_s6  ;;  %s981_s28 = sshll.u32 %s1207_s5, 4  ;;  %s982_s28 = int_to_ptr.vmem [resolvable:$false] %s981_s28 }
  0x2b   : > { %s277_s11 = scalar_lea.hbm %s1649_s1, %s1621_s17  ;;  %s983_s9 = scalar_lea.vmem %s982_s28, 256 }
  0x2c   : > { %p979_p0 = pnand %p977_p13, %p965_p12  ;;  %p984_p3 = scmp.lt.s32.totalorder %s280_s26, %s982_s28 }
  0x2d   : > { %p985_p4 = scmp.lt.s32.totalorder %s983_s9, %s976_s6 }
  0x2e   : > { %p980_p1 = pneg %p979_p0 }
  0x2f   : > { %p986_p5 = por %p985_p4, %p984_p3 }
  0x31   : > { %p987_p10 = pnand %p986_p5, %p980_p1 }
  0x33   : > { %990 = shalt.err (!%p987_p10)
}
  0x34   : > { %844 = dma.hbm_to_vmem [thread:$0]  (!%p1361_p11), %s277_s11, 128, %s280_s26, %s1377_s27  }
  0x35   : > { %s307_s19 = scalar_lea.vmem [#allocation13], %s805_s13  ;;  %s330_s5 = scalar_lea.vmem [#allocation15], %s805_s13 }
  0x36   : > { %s316_s24 = sshll.u32 %s307_s19, 4  ;;  %s339_s20 = sshll.u32 %s330_s5, 4  ;;  %s1387_s24 = int_to_ptr.vmem [resolvable:$true] %s316_s24  ;;  %s1389_s20 = int_to_ptr.vmem [resolvable:$true] %s339_s20 }
  0x37   : > { %1652 = sst [smem:[#allocation30_spill]] %s1389_s20  ;;  %p813_p13 = scmp.ge.s32.totalorder %s1205_s7, 1 }
  0x38   : > { %p347_p0 = scmp.lt.s32.totalorder %s1205_s7, 9  ;;  %s826_s6 = sshll.u32 %s1201_s30, 4 }
  0x39   : > { %s313_s26 = sadd.s32 %s1197_s29, %s826_s6  ;;  %s1655_s3 = sld [smem:[#allocation34_spill]] }
  0x3a   : > { %p1394_p1 = pnand %p813_p13, %p347_p0  ;;  %s808_s11 = sshll.u32 %s313_s26, 7 }
  0x3b   : > { %s1404_s5 = scalar_lea.sflag [#allocation14], %s266_s10  ;;  %s1004_s17 = scalar_lea.vmem %s1387_s24, 512 }
  0x3c   : > { %s1653_s28 = scalar_select %p1394_p1, 1, 0 }
  0x3d   : > { %p1005_p3 = scmp.ne.s32.totalorder %s1387_s24, %s1004_s17  ;;  %s1208_s1 = smov [#allocation13]  }
  0x3e   : > { %1654 = sst [smem:[#allocation31_spill]] %s1653_s28  ;;  %s1009_s30 = sshll.u32 %s1208_s1, 4  ;;  %s1010_s30 = int_to_ptr.vmem [resolvable:$false] %s1009_s30 }
  0x3f   : > { %s315_s13 = scalar_lea.hbm %s1655_s3, %s808_s11  ;;  %p1007_p4 = pnand %p1005_p3, %p965_p12 }
  0x40   : > { %s1011_s15 = scalar_lea.vmem %s1010_s30, 1024  ;;  %p1012_p10 = scmp.lt.s32.totalorder %s1387_s24, %s1010_s30 }
  0x41   : > { %p1008_p5 = pneg %p1007_p4  ;;  %p1013_p13 = scmp.lt.s32.totalorder %s1011_s15, %s1004_s17 }
  0x43   : > { %p1014_p0 = por %p1013_p13, %p1012_p10 }
  0x45   : > { %p1015_p9 = pnand %p1014_p0, %p1008_p5 }
  0x47   : > { %1018 = shalt.err (!%p1015_p9)
}
  0x48   : > { %s1209_s6 = smov 512   ;;  %s1210_s10 = smov 128  }
  0x49   : > { %s1211_s26 = smov 8   ;;  %s1422_s15 = scalar_lea.hbm %s1613_s4, %s808_s11 }
  0x4a   : > { %850 = dma.hbm_to_vmem [thread:$0]  (!%p1361_p11), %s315_s13, 512, %s1387_s24, %s1404_s5, %s1209_s6, %s1210_s10, %s1211_s26  }
  0x4b   : > { %s1656_s17 = sshll.u32 %s1355_s8, 7  ;;  %s1657_s25 = sshll.u32 %s1347_s18, 3 }
  0x4c   : > { %s257_s3 = scalar_lea.hbm %s1609_s0, %s1656_s17  ;;  %s250_s28 = scalar_lea.vmem [#allocation8], %s1657_s25 }
  0x4d   : > { %s259_s27 = sshll.u32 %s250_s28, 4  ;;  %s247_s2 = scalar_lea.sflag [#allocation9], %s1347_s18  ;;  %s260_s27 = int_to_ptr.vmem [resolvable:$true] %s259_s27 }
  0x4e   : > { %s1032_s20 = scalar_lea.vmem %s260_s27, 128  ;;  %s1212_s24 = smov [#allocation8]  }
  0x4f   : > { %p1033_p9 = scmp.ne.s32.totalorder %s260_s27, %s1032_s20  ;;  %s1037_s13 = sshll.u32 %s1212_s24, 4  ;;  %s1038_s13 = int_to_ptr.vmem [resolvable:$false] %s1037_s13 }
  0x50   : > { %s1039_s11 = scalar_lea.vmem %s1038_s13, 256  ;;  %p1040_p5 = scmp.lt.s32.totalorder %s260_s27, %s1038_s13 }
  0x51   : > { %p1035_p3 = pnand %p1033_p9, %p965_p12  ;;  %p1041_p10 = scmp.lt.s32.totalorder %s1039_s11, %s1032_s20 }
  0x53   : > { %p1036_p4 = pneg %p1035_p3  ;;  %p1042_p13 = por %p1041_p10, %p1040_p5 }
  0x55   : > { %p1043_p0 = pnand %p1042_p13, %p1036_p4 }
  0x57   : > { %1046 = shalt.err (!%p1043_p0)
}
  0x58   : > { %s1658_s25 = sld [smem:[#allocation30_spill]]  ;;  %s101_s8 = sadd.s32 1, %s1173_s23 }
  0x59   : > { %841 = dma.hbm_to_vmem [thread:$0]  (!%p1361_p11), %s257_s3, 128, %s260_s27, %s247_s2  }
  0x5a   : > { %p108_p9 = scmp.ne.s32.totalorder %s1173_s23, %s1169_s22  ;;  %p114_p4 = scmp.ne.s32.totalorder %s1169_s22, %s1165_s21 }
  0x5b   : > { %s1443_s18 = scalar_select %p99_p8, %s1173_s23, %s101_s8  }
  0x5c   : > { %p110_p3 = por %p108_p9, %p55_p2  ;;  %s288_s20 = sand.u32 1, %s1173_s23  }
  0x5d   : > { %s804_s28 = sshll.u32 %s1197_s29, 4  ;;  %p1453_p5 = por %p114_p4, %p1329_p6 }
  0x5e   : > { %s1660_s2 = sld [smem:[#allocation33_spill]]  ;;  %s289_s27 = scalar_lea.vmem [#allocation12], %s288_s20 }
  0x5f   : > { %s1659_s1 = scalar_select %p1453_p5, 1, 0 }
  0x60   : > { %s296_s12 = sshll.u32 %s289_s27, 4  ;;  %p1661_p8 = scmp.lt.s32.totalorder %s1205_s7, 8  ;;  %s1462_s12 = int_to_ptr.vmem [resolvable:$true] %s296_s12 }
  0x61   : > { %s1060_s9 = scalar_lea.vmem %s1658_s25, 512  ;;  %s1213_s14 = smov [#allocation15]  }
  0x62   : > { %p1466_p2 = pnand %p1661_p8, %p110_p3  ;;  %p1061_p10 = scmp.ne.s32.totalorder %s1658_s25, %s1060_s9 }
  0x63   : > { %s1065_s19 = sshll.u32 %s1213_s14, 4  ;;  %s1066_s19 = int_to_ptr.vmem [resolvable:$false] %s1065_s19 }
  0x64   : > { %s1460_s3 = scalar_lea.hbm %s1660_s2, %s804_s28  ;;  %p1063_p6 = pnand %p1061_p10, %p965_p12 }
  0x65   : > { %s1067_s24 = scalar_lea.vmem %s1066_s19, 1024  ;;  %p1068_p0 = scmp.lt.s32.totalorder %s1658_s25, %s1066_s19 }
  0x66   : > { %p1064_p13 = pneg %p1063_p6  ;;  %p1069_p9 = scmp.lt.s32.totalorder %s1067_s24, %s1060_s9 }
  0x68   : > { %p1070_p4 = por %p1069_p9, %p1068_p0 }
  0x6a   : > { %p1071_p5 = pnand %p1070_p4, %p1064_p13 }
  0x6c   : > { %1074 = shalt.err (!%p1071_p5)
}
  0x6d   : > { %853 = dma.hbm_to_vmem [thread:$0]  (!%p1361_p11), %s1422_s15, 512, %s1658_s25, %s1404_s5, %s1209_s6, %s1210_s10, %s1211_s26  }
  0x6e   : > { %p1077_p12 = pneg %p1466_p2  ;;  %s1088_s13 = scalar_lea.vmem %s1462_s12, 16 }
  0x6f   : > { %p1089_p3 = scmp.ne.s32.totalorder %s1462_s12, %s1088_s13  ;;  %s1214_s11 = smov [#allocation12]  }
  0x70   : > { %s1093_s8 = sshll.u32 %s1214_s11, 4  ;;  %s1094_s8 = int_to_ptr.vmem [resolvable:$false] %s1093_s8 }
  0x71   : > { %p1091_p8 = pnand %p1089_p3, %p1077_p12  ;;  %s1095_s16 = scalar_lea.vmem %s1094_s8, 32 }
  0x72   : > { %p1096_p5 = scmp.lt.s32.totalorder %s1462_s12, %s1094_s8  ;;  %p1097_p6 = scmp.lt.s32.totalorder %s1095_s16, %s1088_s13 }
  0x73   : > { %p1092_p10 = pneg %p1091_p8 }
  0x74   : > { %p1098_p13 = por %p1097_p6, %p1096_p5 }
  0x76   : > { %p1099_p0 = pnand %p1098_p13, %p1092_p10 }
  0x78   : > { %1102 = shalt.err (!%p1099_p0)
}
  0x79   : > { %s1663_s20 = sld [smem:[#allocation29_spill]] }
  0x7a   : > { %s1665_s6 = sld [smem:[#allocation20_spill]] (!%p1394_p1) }
  0x7b   : > { %351 = sbr.rel (%p1394_p1) target bundleno = 642 (0x282), region = 40 }
  0x7f   : > { %847 = dma.hbm_to_vmem [thread:$0]  (!%p1466_p2), %s1460_s3, 16, %s1462_s12, %s1663_s20  }
  0x80   : > { %s1497_s26 = sand.u32 1, %s1665_s6  }
  0x81   : > { %s814_s15 = sshll.u32 %s1497_s26, 3  ;;  %s354_s25 = scalar_lea.sflag [#allocation9], %s1497_s26 }
  0x82   : > { %s1501_s28 = scalar_lea.vmem [#allocation8], %s814_s15 }
  0x83   : > { %1148 = dma.done.wait (%p1337_p7), %s354_s25, 128  }
  0x84   : > { %1150 = vsyncadd (%p1337_p7), %s354_s25, 4294967168  ;;  %s1667_s30 = sadd.s32 4294967295, %s1205_s7   ;;  %s1509_s3 = scalar_lea.vmem [#allocation10], %s814_s15 }
  0x85   : > { %s362_s17 = sand.u32 1, %s1667_s30  }
  0x86   : > { %s363_s2 = scalar_lea.sflag [#allocation11], %s362_s17 }
  0x87   : > { %1152 = dma.done.wait (%p1337_p7), %s363_s2, 128  }
  0x88   : > { %1154 = vsyncadd (%p1337_p7), %s363_s2, 4294967168  ;;  %s373_s27 = sand.u32 1, %s1169_s22   ;;  %p1668_p11 = scmp.ne.s32.totalorder %s1659_s1, 0 }
  0x89   : > { %s1516_s12 = scalar_lea.vmem [#allocation12], %s373_s27 }
  0x8a   : > { %1156 = dma.done.wait (%p1668_p11), %s363_s2, 16  }
  0x8b   : > { %1158 = vsyncadd (%p1668_p11), %s363_s2, 4294967280  ;;  %s816_s21 = sshll.u32 %s1497_s26, 5  ;;  %s380_s9 = scalar_lea.sflag [#allocation14], %s362_s17 }
  0x8c   : > { %s1523_s14 = scalar_lea.vmem [#allocation13], %s816_s21 }
  0x8d   : > { %1160 = dma.done.wait (%p1337_p7), %s380_s9, 1024  }
  0x8e   : > { %1162 = vsyncadd (%p1337_p7), %s380_s9, 4294966272  ;;  %s1669_s19 = sld [smem:[#allocation23_spill]]  ;;  %s1542_s15 = scalar_lea.vmem [#allocation15], %s816_s21 }
  0x8f   : > { %s1670_s8 = sld [smem:[#allocation35_spill]] }
  0x90   : > { %s1671_s26 = sld [smem:[#allocation36_spill]] }
  0x91   : > { %s1672_s25 = sld [smem:[#allocation22_spill]] }
  0x94   : > { %p446_p1 = scmp.lt.s32.totalorder %s1669_s19, 1  ;;  %s819_s24 = sshll.u32 %s1669_s19, 2 }
  0x95   : > { %p451_p2 = scmp.lt.s32.totalorder %s819_s24, 7 }
  0x96   : > { %s1693_s19 = smov (!%p446_p1, %s1669_s19), 1 }
  0x97   : > { %s818_s1 = sshll.u32 %s1693_s19, 3  ;;  %s1695_s24 = smov (!%p451_p2, %s819_s24), 7 }
  0x98   : > { %s1535_s16 = scalar_lea.vmem %s1670_s8, %s818_s1  ;;  %s820_s20 = sshll.u32 %s1695_s24, 3 }
  0x99   : > { %s1540_s10 = scalar_lea.vmem %s1671_s26, %s820_s20  ;;  %p821_p7 = scmp.ne.s32.totalorder %s1672_s25, 0 }
  0x9b   : > { %459 = sbr.rel (%p821_p7) target bundleno = 166 (0xa6), region = 64 }
  0xa0   : > { %vm460_vm0 = vcmask 7168   ;;  %v1215_v0 = vmov -inf   ;;  %v1216_v1 = vmov 0.0  }
  0xa1   : > { %461 = vst.msk [vmem:[#allocation2] sm:$0xff] %vm460_vm0, %v1215_v0  ;;  %462 = vst.msk [vmem:[#allocation4] sm:$0xff] %vm460_vm0, %v1215_v0 }
  0xa2   : > { %463 = vst.msk [vmem:[#allocation3] sm:$0xff] %vm460_vm0, %v1216_v1  ;;  %464 = vst.msk [vmem:[#allocation5] sm:$0xff] %vm460_vm0, %v1216_v1 }
  0xa3   : > { %465 = vst.msk [vmem:[#allocation6] sm:$0xff] %vm460_vm0, %v1216_v1  ;;  %466 = vst.msk [vmem:[#allocation7] sm:$0xff] %vm460_vm0, %v1216_v1 }
  0xa4   : > { %467 = vst.msk [vmem:[#allocation7 + $0x8] sm:$0xff] %vm460_vm0, %v1216_v1  ;;  %468 = vst.msk [vmem:[#allocation7 + $0x10] sm:$0xff] %vm460_vm0, %v1216_v1 }
  0xa5   : > { %469 = vst.msk [vmem:[#allocation7 + $0x18] sm:$0xff] %vm460_vm0, %v1216_v1 }
  0xa6 PF: > { %v472_v2 = vld [vmem:[%s1509_s3] sm:$0xff]  ;;  %v470_v5 = vld [vmem:[%s1501_s28] sm:$0xff]  ;;  %v1217_v8 = vmov 0   ;;  %vm502_vm1 = vcmask 7168   ;;  %s1673_s28 = sld [smem:[#allocation22_spill]] }
  0xa7   : > { %v822_v3 = vld [vmem:[%s1516_s12] ss:$0 sm:$0xff]  ;;  %v471_v7 = vmul.f32 10.0, %v470_v5  ;;  %949 = vset.pattern.permute.xlu1 %v1217_v8  ;;  %950 = vset.pattern.permute.xlu0 %v1217_v8  ;;  %v534_v23 = vld [vmem:[%s1523_s14] sm:$0xff]  ;;  %v535_v27 = vld [vmem:[%s1523_s14 + $0x8] sm:$0xff] }
  0xa8   : > { %v480_v4 = vsub.f32 %v472_v2, %v822_v3  ;;  %v505_v9 = vld [vmem:[#allocation4] sm:$0xff]  ;;  %v482_v12 = vld [vmem:[#allocation2] sm:$0xff] }
  0xa9   : > { %v538_v24 = vld [vmem:[%s1542_s15] sm:$0xff]  ;;  %v539_v28 = vld [vmem:[%s1542_s15 + $0x8] sm:$0xff]  ;;  %v536_v32 = vld [vmem:[%s1523_s14 + $0x10] sm:$0xff] }
  0xaa   : > { %v481_v6 = vmul.f32 25.0, %v480_v4  ;;  %v542_v26 = vsub.f32 %v534_v23, %v538_v24  ;;  %v543_v31 = vsub.f32 %v535_v27, %v539_v28  ;;  %v540_v33 = vld [vmem:[%s1542_s15 + $0x10] sm:$0xff]  ;;  %v537_v37 = vld [vmem:[%s1523_s14 + $0x18] sm:$0xff] }
  0xab   : > { %v544_v35 = vsub.f32 %v536_v32, %v540_v33  ;;  %v541_v38 = vld [vmem:[%s1542_s15 + $0x18] sm:$0xff]  ;;  %v520_v45 = vld [vmem:[#allocation5] sm:$0xff]  ;;  %v547_v57 = vld [vmem:[#allocation7 + $0x8] sm:$0xff] }
  0xac   : > { %506 = vmax.xlane.f32.xlu0 %v481_v6  ;;  %v550_v30 = vmul.f32 %v542_v26, %v542_v26  ;;  %v551_v34 = vmul.f32 %v543_v31, %v543_v31  ;;  %v545_v39 = vsub.f32 %v537_v37, %v541_v38  ;;  %v486_v49 = vld [vmem:[#allocation3] sm:$0xff]  ;;  %v548_v60 = vld [vmem:[#allocation7 + $0x10] sm:$0xff]  ;;  %v526_v62 = vld [vmem:[#allocation6] sm:$0xff]  ;;  %p823_p9 = scmp.ne.s32.totalorder %s1673_s28, 3 }
  0xad   : > { %v552_v36 = vmul.f32 %v544_v35, %v544_v35  ;;  %v546_v54 = vld [vmem:[#allocation7] sm:$0xff]  ;;  %v549_v3 = vld [vmem:[#allocation7 + $0x18] sm:$0xff] }
  0xae   : > { %v553_v41 = vmul.f32 %v545_v39, %v545_v39 }
  0xb0   : > { %483 = vmax.xlane.f32.xlu0 %v471_v7 }
 0x135   : > { %v507_v10 = vpop.xlane.xlu0 %506 }
 0x136   : > { %v508_v11 = vmax.f32 %v505_v9, %v507_v10 }
 0x138   : > { %v509_v13 = vsub.f32 %v505_v9, %v508_v11  ;;  %533 = vst.msk [vmem:[#allocation4] sm:$0xff] %vm502_vm1, %v508_v11  ;;  %514 = vperm.xlu1 %949, %v508_v11  }
 0x139   : > { %v484_v14 = vpop.xlane.xlu0 %483 }
 0x13a   : > { %v485_v15 = vmax.f32 %v482_v12, %v484_v14  ;;  %v510_v42 = vmul.f32 1.442695, %v509_v13 }
 0x13c   : > { %v487_v16 = vsub.f32 %v482_v12, %v485_v15  ;;  %504 = vst.msk [vmem:[#allocation2] sm:$0xff] %vm502_vm1, %v485_v15  ;;  %493 = vperm.xlu1 %949, %v485_v15  }
 0x13e   : > { %v488_v43 = vmul.f32 1.442695, %v487_v16 }
 0x1b3   : > { %v515_v17 = vpop.permute.xlu1 %514 }
 0x1b4   : > { %v517_v18 = vsub.f32 %v481_v6, %v515_v17 }
 0x1b6   : > { %v518_v19 = vmul.f32 1.442695, %v517_v18 }
 0x1b7   : > { %v494_v20 = vpop.permute.xlu1 %493 }
 0x1b8   : > { %951 = vpow2.f32 %v518_v19  ;;  %v496_v21 = vsub.f32 %v471_v7, %v494_v20 }
 0x1ba   : > { %v497_v22 = vmul.f32 1.442695, %v496_v21 }
 0x1bc   : > { %953 = vpow2.f32 %v497_v22 }
 0x1bd   : > { %955 = vpow2.f32 %v510_v42 }
 0x1be   : > { %957 = vpow2.f32 %v488_v43 }
 0x1c5   : > { %v952_v25 = vpop.eup %951 }
 0x1c6   : > { %522 = vadd.xlane.f32.xlu1 %v952_v25  ;;  %v528_v40 = vmul.f32 %v952_v25, %v471_v7 }
 0x1c9   : > { %v954_v29 = vpop.eup %953 }
 0x1ca   : > { %499 = vadd.xlane.f32.xlu0 %v954_v29  ;;  %v956_v44 = vpop.eup %955 }
 0x1cb   : > { %v521_v46 = vmul.f32 %v956_v44, %v520_v45  ;;  %v958_v47 = vpop.eup %957  ;;  %v527_v0 = vmul.f32 %v956_v44, %v526_v62 }
 0x1cc   : > { %v490_v51 = vmul.f32 %v958_v47, %v486_v49 }
 0x1ce   : > { %554 = vadd.xlane.f32.xlu0 %v550_v30 }
 0x1d2   : > { %556 = vadd.xlane.f32.xlu0 %v551_v34 }
 0x1d6   : > { %558 = vadd.xlane.f32.xlu0 %v552_v36 }
 0x1da   : > { %529 = vadd.xlane.f32.xlu0 %v528_v40 }
 0x1de   : > { %560 = vadd.xlane.f32.xlu0 %v553_v41 }
 0x24f   : > { %v523_v48 = vpop.xlane.xlu1 %522 }
 0x250   : > { %v524_v50 = vadd.f32 %v523_v48, %v521_v46 }
 0x252   : > { %525 = vst.msk [vmem:[#allocation5] sm:$0xff] %vm502_vm1, %v524_v50 }
 0x253   : > { %v500_v52 = vpop.xlane.xlu0 %499 }
 0x254   : > { %v501_v53 = vadd.f32 %v500_v52, %v490_v51 }
 0x256   : > { %503 = vst.msk [vmem:[#allocation3] sm:$0xff] %vm502_vm1, %v501_v53 }
 0x257   : > { %v555_v55 = vpop.xlane.xlu0 %554 }
 0x258   : > { %v562_v56 = vadd.f32 %v555_v55, %v546_v54 }
 0x25a   : > { %566 = vst.msk [vmem:[#allocation7] sm:$0xff] %vm502_vm1, %v562_v56 }
 0x25b   : > { %v557_v58 = vpop.xlane.xlu0 %556 }
 0x25c   : > { %v563_v59 = vadd.f32 %v557_v58, %v547_v57 }
 0x25e   : > { %567 = vst.msk [vmem:[#allocation7 + $0x8] sm:$0xff] %vm502_vm1, %v563_v59 }
 0x25f   : > { %v559_v61 = vpop.xlane.xlu0 %558 }
 0x260   : > { %v564_v63 = vadd.f32 %v559_v61, %v548_v60 }
 0x262   : > { %568 = vst.msk [vmem:[#allocation7 + $0x10] sm:$0xff] %vm502_vm1, %v564_v63 }
 0x263   : > { %v530_v1 = vpop.xlane.xlu0 %529 }
 0x264   : > { %v531_v2 = vadd.f32 %v530_v1, %v527_v0 }
 0x266   : > { %532 = vst.msk [vmem:[#allocation6] sm:$0xff] %vm502_vm1, %v531_v2  ;;  %573 = sbr.rel (%p823_p9) target bundleno = 642 (0x282), region = 68 }
 0x267   : > { %v561_v4 = vpop.xlane.xlu0 %560 }
 0x268   : > { %v565_v5 = vadd.f32 %v561_v4, %v549_v3 }
 0x26a   : > { %569 = vst.msk [vmem:[#allocation7 + $0x18] sm:$0xff] %vm502_vm1, %v565_v5 }
 0x26b   : > { %v585_v6 = vld [vmem:[#allocation7] sm:$0xff]  ;;  %v586_v7 = vld [vmem:[#allocation7 + $0x8] sm:$0xff]  ;;  %v587_v8 = vld [vmem:[#allocation7 + $0x10] sm:$0xff] }
 0x26c   : > { %589 = vst.msk [vmem:[%s1540_s10] sm:$0xff] %vm502_vm1, %v585_v6  ;;  %v575_v9 = vld [vmem:[#allocation3] sm:$0xff]  ;;  %590 = vst.msk [vmem:[%s1540_s10 + $0x8] sm:$0xff] %vm502_vm1, %v586_v7  ;;  %v580_v10 = vld [vmem:[#allocation5] sm:$0xff] }
 0x26d   : > { %959 = vlog2.f32 %v575_v9  ;;  %591 = vst.msk [vmem:[%s1540_s10 + $0x10] sm:$0xff] %vm502_vm1, %v587_v8  ;;  %v579_v12 = vld [vmem:[#allocation6] sm:$0xff] }
 0x26e   : > { %961 = vrcp.f32 %v580_v10  ;;  %v574_v14 = vld [vmem:[#allocation2] sm:$0xff] }
 0x271   : > { %v588_v11 = vld [vmem:[#allocation7 + $0x18] sm:$0xff] }
 0x272   : > { %592 = vst.msk [vmem:[%s1540_s10 + $0x18] sm:$0xff] %vm502_vm1, %v588_v11 }
 0x27a   : > { %v960_v13 = vpop.eup %959 }
 0x27b   : > { %v962_v15 = vpop.eup %961  ;;  %v577_v16 = vmul.f32 0.6931472, %v960_v13 }
 0x27c   : > { %v582_v17 = vmul.f32 %v962_v15, %v579_v12 }
 0x27d   : > { %v578_v18 = vadd.f32 %v577_v16, %v574_v14 }
 0x27f   : > { %v583_v19 = vsub.f32 %v578_v18, %v582_v17 }
 0x281   : > { %584 = vst.msk [vmem:[%s1535_s16] sm:$0xff] %vm502_vm1, %v583_v19 }
 0x282 PF: > { %s26_s7 = sadd.s32 1, %s1205_s7   ;;  %s1674_s24 = sld [smem:[#allocation20_spill]] }
 0x283   : > { %p23_p4 = scmp.ge.s32.totalorder %s26_s7, 10   ;;  %s1675_s25 = sld [smem:[#allocation21_spill]] }
 0x284   : > { %s1676_s26 = sld [smem:[#allocation28_spill]]  ;;  %s1680_s21 = smov %s1169_s22 }
 0x285   : > { %s1677_s28 = sld [smem:[#allocation24_spill]]  ;;  %s1681_s22 = smov %s1173_s23 }
 0x286   : > { %s1678_s30 = sld [smem:[#allocation25_spill]]  ;;  %s1682_s23 = smov %s1443_s18 }
 0x287   : > { %s1679_s17 = sld [smem:[#allocation26_spill]]  ;;  %s1683_s27 = smov %s1197_s29 }
 0x289   :  { %25 = sbr.rel (!%p23_p4) target bundleno = 17 (0x11), region = 148 }
 0x28c   : > { %s1684_s29 = smov %s1678_s30 }
 0x28d   : > { %s1685_s30 = smov %s1679_s17 }
 0x28e   :  { %629 = vsyncpa [#allocation9], 1 }
 0x28f   :  { %631 = vsyncpa [#allocation9 + $0x1], 1 }
 0x290   :  { %632 = vsyncpa [#allocation11], 1 }
 0x291   :  { %634 = vsyncpa [#allocation11 + $0x1], 1 }
 0x292   :  { %635 = vsyncpa [#allocation14], 1 }
 0x293   :  { %637 = vsyncpa [#allocation14 + $0x1], 1 }

</bundles_post_ra>
